<compile_context>
chip_gen: v7x
topology: tpu7x:2x2x1
jax: 0.10.0
libtpu: 0.0.40
codegen_flags: <defaults>
</compile_context>

<pallas_src>
import math
from functools import partial, reduce

import jax
import jax.numpy as jnp
import numpy as np
from jax.experimental import pallas as pl
from jax.experimental.pallas import tpu as pltpu

N_QUBITS = 4
N_LAYERS = 4
INPUT_LEN = 2 * N_QUBITS      # 8 angles per patch
DIM = 2 ** N_QUBITS           # 16-dim statevector
TILE_MAX = 8192               # max samples (lanes) per grid step


def _round_up(x, m):
    return -(-x // m) * m


# ----------------------------------------------------------------------------
# Static tables (host numpy, passed to the kernel as *inputs*, never captured).
# ----------------------------------------------------------------------------
def _bit_table():
    """bits[q, k] = value of wire-q bit of basis state k (wire 0 = MSB)."""
    k = np.arange(DIM)
    q = np.arange(N_QUBITS)
    return ((k[None, :] >> (N_QUBITS - 1 - q[:, None])) & 1).astype(np.float32)


BITS_NP = _bit_table()                                              # (4, 16)
# <Z_q> readout signs, duplicated over [fin_re; fin_im] rows:        (4, 32)
ZSIGN32_NP = np.tile((1.0 - 2.0 * BITS_NP), (1, 2)).astype(np.float32)


def _kernel_tables():
    """Selection matrices used inside the kernel.

    "opnd" rows r = 4*blk + h:
        blk 0 -> (q=0, bit=h>>1)   left operand of pair (q0,q1)
        blk 1 -> (q=2, bit=h>>1)   left operand of pair (q2,q3)
        blk 2 -> (q=1, bit=h&1)    right operand of pair (q0,q1)
        blk 3 -> (q=3, bit=h&1)    right operand of pair (q2,q3)
    MC @ cos-block / MS @ sin-block give (rows 0:16) the amplitude magnitude
    selection and (rows 16:32) the phase cos / signed sin selection.
    SEXP expands the 8 pair amplitudes to the 16-dim basis (rows 0:16 = L,
    rows 16:32 = R, with psi[k] = L[k] * R[k]).
    """
    mc = np.zeros((2 * DIM, 2 * N_QUBITS), np.float32)
    ms = np.zeros((2 * DIM, 2 * N_QUBITS), np.float32)
    q_of_block = [0, 2, 1, 3]
    for r in range(DIM):
        blk, h = divmod(r, 4)
        q = q_of_block[blk]
        bit = (h >> 1) if blk < 2 else (h & 1)
        if bit == 0:
            mc[r, q] = 1.0                               # m0_q = cos row q
        else:
            ms[r, q] = 1.0                               # m1_q = sin row q
        mc[DIM + r, N_QUBITS + q] = 1.0                  # cos(phi_q/2)
        ms[DIM + r, N_QUBITS + q] = 1.0 if bit else -1.0  # +/- sin(phi_q/2)

    sexp = np.zeros((2 * DIM, 2 * N_QUBITS), np.float32)
    for k in range(DIM):
        sexp[k, k >> 2] = 1.0                            # L[k] = pair01[k>>2]
        sexp[DIM + k, N_QUBITS + (k & 3)] = 1.0          # R[k] = pair23[k&3]
    return mc, ms, sexp


MC_NP, MS_NP, SEXP_NP = _kernel_tables()


# ----------------------------------------------------------------------------
# Weight-only 16x16 unitary, built with jnp (trace/grad safe), real + imag.
# ----------------------------------------------------------------------------
def _build_unitary_jnp(weights):
    """Real/imag parts of the weight-dependent 16x16 circuit unitary.

    Per layer: CRZ(w[l, i]) on wires [i, (i+1)%4] (all diagonal, commute),
    then RY(w[l, 4+q]) on wire q (wire 0 = kron MSB).
    """
    w = jnp.asarray(weights, dtype=jnp.float32)
    bits = BITS_NP
    u_re = jnp.eye(DIM, dtype=jnp.float32)
    u_im = jnp.zeros((DIM, DIM), dtype=jnp.float32)
    hp = jax.lax.Precision.HIGHEST

    for layer in range(N_LAYERS):
        # CRZ entangling sub-layer (diagonal): accumulate total phase angle.
        ang = jnp.zeros((DIM,), dtype=jnp.float32)
        for i in range(N_QUBITS):
            ctrl, tgt = i, (i + 1) % N_QUBITS
            coeff = (-0.5 * (1.0 - 2.0 * bits[tgt]) * bits[ctrl]).astype(np.float32)
            ang = ang + w[layer, i] * jnp.asarray(coeff)
        d_re = jnp.cos(ang)[:, None]
        d_im = jnp.sin(ang)[:, None]
        du_re = d_re * u_re - d_im * u_im
        du_im = d_re * u_im + d_im * u_re

        # RY sub-layer on every wire (real matrix, kron with wire 0 = MSB).
        ry_mats = []
        for q in range(N_QUBITS):
            t = w[layer, N_QUBITS + q] * 0.5
            c, s = jnp.cos(t), jnp.sin(t)
            ry_mats.append(jnp.stack([jnp.stack([c, -s]), jnp.stack([s, c])]))
        ry_full = reduce(jnp.kron, ry_mats)                        # (16, 16) real

        u_re = jnp.matmul(ry_full, du_re, precision=hp)
        u_im = jnp.matmul(ry_full, du_im, precision=hp)
    return u_re, u_im


# ----------------------------------------------------------------------------
# Vectorized patch extraction (replaces the Python double loop).
# ----------------------------------------------------------------------------
def _extract_angles(x, kernel_size):
    """Stride-2 patch extraction + flatten / tile / truncate to 8 angles."""
    bs, c, H, W = x.shape
    K = kernel_size
    i_idx = np.arange(0, H - K + 1, 2)
    j_idx = np.arange(0, W - K + 1, 2)
    Ph, Pw = i_idx.size, j_idx.size
    kk = np.arange(K)
    row_idx = i_idx[:, None] + kk[None, :]                         # (Ph, K)
    col_idx = j_idx[:, None] + kk[None, :]                         # (Pw, K)

    # TODO(synk): for K >> stride this gather materializes an O((K/2)^2 * x)
    # intermediate; switch to lax.conv_general_dilated_patches there.
    patches = x[:, :, row_idx[:, :, None, None], col_idx[None, None, :, :]]
    patches = jnp.transpose(patches, (0, 2, 4, 1, 3, 5))           # (bs,Ph,Pw,c,K,K)
    flat = patches.reshape(bs, Ph * Pw, c * K * K)

    F = c * K * K
    if F < INPUT_LEN:
        rep = math.ceil(INPUT_LEN / F)
        flat = jnp.tile(flat, (1, 1, rep))
    flat = flat[:, :, :INPUT_LEN]
    P = Ph * Pw
    return flat.reshape(bs * P, INPUT_LEN), bs, P


# ----------------------------------------------------------------------------
# Pallas kernel (samples on lanes):
#   ang_ref  : (8, T)   rows 0:4 = RY angles + pi/2 (q0..q3), rows 4:8 = RZ
#   mc_ref   : (32, 8)  selection applied to cos(ang/2)
#   ms_ref   : (32, 8)  selection applied to sin(ang/2)
#   sexp_ref : (32, 8)  pair -> 16-dim expansion
#   wa_ref   : (32, 16) [[U_re],[U_im]]
#   wb_ref   : (32, 16) [[-U_im],[U_re]]
#   z_ref    : (4, 32)  PauliZ signs (duplicated for re/im halves of fin)
#   out_ref  : (4, T)   <Z_q> per sample
# ----------------------------------------------------------------------------
def _quanv_kernel(ang_ref, mc_ref, ms_ref, sexp_ref, wa_ref, wb_ref, z_ref,
                  out_ref):
    dot = lambda a, b: jnp.dot(a, b, preferred_element_type=jnp.float32)

    half = ang_ref[...] * 0.5                 # (8, T)
    c8 = jnp.cos(half)                        # rows 0:4 = m0_q, 4:8 = cos(phi/2)
    s8 = jnp.sin(half)                        # rows 0:4 = m1_q, 4:8 = sin(phi/2)

    xc = dot(mc_ref[...], c8)                 # (32, T)
    xs = dot(ms_ref[...], s8)                 # (32, T)
    mag = xc[:DIM, :] + xs[:DIM, :]           # amplitude magnitude per operand row
    opnd_re = mag * xc[DIM:, :]               # (16, T)
    opnd_im = mag * xs[DIM:, :]

    # Two-qubit pair amplitudes: rows 0:4 = pair(q0,q1), rows 4:8 = pair(q2,q3)
    lre, rre = opnd_re[:2 * N_QUBITS, :], opnd_re[2 * N_QUBITS:, :]
    lim, rim = opnd_im[:2 * N_QUBITS, :], opnd_im[2 * N_QUBITS:, :]
    pair_re = lre * rre - lim * rim           # (8, T)
    pair_im = lre * rim + lim * rre

    # Expand pairs to the 16-dim basis and take their product -> |psi>
    ere = dot(sexp_ref[...], pair_re)         # (32, T): rows 0:16 = L, 16:32 = R
    eim = dot(sexp_ref[...], pair_im)
    psi_re = ere[:DIM, :] * ere[DIM:, :] - eim[:DIM, :] * eim[DIM:, :]   # (16, T)
    psi_im = ere[:DIM, :] * eim[DIM:, :] + eim[:DIM, :] * ere[DIM:, :]

    # Apply the weight unitary (real-ified) and read out <Z_q>.
    fin = dot(wa_ref[...], psi_re) + dot(wb_ref[...], psi_im)            # (32, T)
    out_ref[...] = dot(z_ref[...], fin * fin)                            # (4, T)


# ----------------------------------------------------------------------------
# Wrapper: Quanv2d.forward
# ----------------------------------------------------------------------------
@partial(jax.jit, static_argnames=("kernel_size",))
def quanv2d_forward(x, weights, kernel_size):
    angles, bs, P = _extract_angles(x, kernel_size)                # (N, 8)
    N = bs * P

    # (N, 8) cols [ry0, rz0, ry1, rz1, ...] -> (8, N) rows [ry0..ry3, rz0..rz3]
    ang = angles.astype(jnp.float32).reshape(N, N_QUBITS, 2)
    ang = ang.transpose(2, 1, 0).reshape(2 * N_QUBITS, N)
    # Bake +pi/2 into the RY rows so cos/sin of (angle/2) give m0/m1 directly.
    offset = np.concatenate(
        [np.full((N_QUBITS, 1), 0.5 * np.pi, np.float32),
         np.zeros((N_QUBITS, 1), np.float32)], axis=0)
    ang = ang + jnp.asarray(offset)

    # Tile selection: big tiles, but keep >= 2 grid steps when possible so the
    # "parallel" grid axis can shard across both v7x TensorCores.
    n128 = _round_up(N, 128)
    if n128 <= 256:
        tile = n128
    else:
        tile = min(TILE_MAX, _round_up(-(-n128 // 2), 128))
    n_pad = _round_up(N, tile)
    ang = jnp.pad(ang, ((0, 0), (0, n_pad - N)))

    # Weight-dependent unitary, real-ified and column-split.
    u_re, u_im = _build_unitary_jnp(weights)                       # (16,16) each
    wa = jnp.concatenate([u_re, u_im], axis=0)                     # (32, 16)
    wb = jnp.concatenate([-u_im, u_re], axis=0)                    # (32, 16)

    mc = jnp.asarray(MC_NP)
    ms = jnp.asarray(MS_NP)
    sexp = jnp.asarray(SEXP_NP)
    z32 = jnp.asarray(ZSIGN32_NP)

    def const_spec(shape):
        return pl.BlockSpec(shape, lambda i: (0, 0))

    out = pl.pallas_call(
        _quanv_kernel,
        out_shape=jax.ShapeDtypeStruct((N_QUBITS, n_pad), jnp.float32),
        grid=(n_pad // tile,),
        in_specs=[
            pl.BlockSpec((2 * N_QUBITS, tile), lambda i: (0, i)),  # angles
            const_spec((2 * DIM, 2 * N_QUBITS)),                   # MC
            const_spec((2 * DIM, 2 * N_QUBITS)),                   # MS
            const_spec((2 * DIM, 2 * N_QUBITS)),                   # SEXP
            const_spec((2 * DIM, DIM)),                            # WA
            const_spec((2 * DIM, DIM)),                            # WB
            const_spec((N_QUBITS, 2 * DIM)),                       # Z signs
        ],
        out_specs=pl.BlockSpec((N_QUBITS, tile), lambda i: (0, i)),
        compiler_params=pltpu.CompilerParams(
            dimension_semantics=("parallel",),
            vmem_limit_bytes=32 * 1024 * 1024),
    )(ang, mc, ms, sexp, wa, wb, z32)

    return out[:, :N].T.reshape(bs, P * N_QUBITS)


# ----------------------------------------------------------------------------
# Pure numpy reference (float64 full statevector sim) for verification.
# ----------------------------------------------------------------------------
def _build_unitary_np(weights):
    w = np.asarray(weights, dtype=np.float64)
    bits = BITS_NP.astype(np.float64)

    def ry(t):
        c, s = np.cos(t / 2.0), np.sin(t / 2.0)
        return np.array([[c, -s], [s, c]], dtype=np.complex128)

    U = np.eye(DIM, dtype=np.complex128)
    for layer in range(N_LAYERS):
        d = np.ones(DIM, dtype=np.complex128)
        for i in range(N_QUBITS):
            ctrl, tgt = i, (i + 1) % N_QUBITS
            phase = np.exp(-1j * (w[layer, i] / 2.0) * (1.0 - 2.0 * bits[tgt]))
            d = d * np.where(bits[ctrl] == 1.0, phase, 1.0)
        ry_full = reduce(np.kron,
                         [ry(w[layer, N_QUBITS + q]) for q in range(N_QUBITS)])
        U = (ry_full @ np.diag(d)) @ U
    return U


def _reference(theta, phi, U, zsign):
    theta = np.asarray(theta, dtype=np.float64)
    phi = np.asarray(phi, dtype=np.float64)
    m0 = (np.cos(theta / 2) - np.sin(theta / 2)) / np.sqrt(2.0)
    m1 = (np.cos(theta / 2) + np.sin(theta / 2)) / np.sqrt(2.0)
    a = m0 * np.exp(-0.5j * phi)
    b = m1 * np.exp(0.5j * phi)
    states = np.stack([a, b], axis=-1)                             # (N, 4, 2)
    psi = states[:, 0, :]
    for q in range(1, N_QUBITS):
        psi = (psi[:, :, None] * states[:, q, None, :]).reshape(psi.shape[0], -1)
    fin = psi @ U.T
    probs = np.abs(fin) ** 2
    return probs @ np.asarray(zsign, dtype=np.float64)


if __name__ == "__main__":
    key = jax.random.PRNGKey(0)
    kx1, kx2, kw = jax.random.split(key, 3)

    # PennyLane TorchLayer default init is U(0, 2*pi); done deterministically.
    weights = jax.random.uniform(kw, (N_LAYERS, 2 * N_QUBITS),
                                 minval=0.0, maxval=2.0 * math.pi,
                                 dtype=jnp.float32)

    zsign16 = (1.0 - 2.0 * BITS_NP.T).astype(np.float64)           # (16, 4)
    U_ref = _build_unitary_np(np.asarray(weights))

    # Two small configs, exercising both the repeat (c*K*K < 8) and truncate
    # (c*K*K >= 8) branches of forward().
    configs = [((2, 1, 12, 12), 2, kx1),
               ((2, 4, 16, 16), 2, kx2)]

    for shape, K, kx in configs:
        x = jax.random.uniform(kx, shape, dtype=jnp.float32)
        out = quanv2d_forward(x, weights, kernel_size=K)
        out = jax.block_until_ready(out)

        angles, bs, P = _extract_angles(x, K)
        ang_np = np.asarray(angles)
        ref = _reference(ang_np[:, 0::2], ang_np[:, 1::2],
                         U_ref, zsign16).reshape(bs, P * N_QUBITS)

        assert out.shape == (bs, P * N_QUBITS)
        np.testing.assert_allclose(np.asarray(out), ref, atol=2e-2, rtol=0)

    print("KERNEL_OK")
</pallas_src>

<mosaic_0001>
module attributes {stable_mosaic.version = 11 : i64} {
  func.func @_quanv_kernel(%arg0: i32, %arg1: memref<8x128xf32, #tpu.memory_space<vmem>>, %arg2: memref<32x8xf32, #tpu.memory_space<vmem>>, %arg3: memref<32x8xf32, #tpu.memory_space<vmem>>, %arg4: memref<32x8xf32, #tpu.memory_space<vmem>>, %arg5: memref<32x16xf32, #tpu.memory_space<vmem>>, %arg6: memref<32x16xf32, #tpu.memory_space<vmem>>, %arg7: memref<4x32xf32, #tpu.memory_space<vmem>>, %arg8: memref<4x128xf32, #tpu.memory_space<vmem>>) attributes {dimension_semantics = [#tpu.dimension_semantics<parallel>], iteration_bounds = array<i64: 1>, scalar_prefetch = 0 : i64, scratch_operands = 0 : i64, tpu.core_type = #tpu.core_type<tc>, window_params = [{transform_indices = @transform_0, window_bounds = array<i64: 8, 128>}, {pipeline_mode = #tpu.pipeline_mode<synchronous>, transform_indices = @transform_1, window_bounds = array<i64: 32, 8>}, {pipeline_mode = #tpu.pipeline_mode<synchronous>, transform_indices = @transform_2, window_bounds = array<i64: 32, 8>}, {pipeline_mode = #tpu.pipeline_mode<synchronous>, transform_indices = @transform_3, window_bounds = array<i64: 32, 8>}, {pipeline_mode = #tpu.pipeline_mode<synchronous>, transform_indices = @transform_4, window_bounds = array<i64: 32, 16>}, {pipeline_mode = #tpu.pipeline_mode<synchronous>, transform_indices = @transform_5, window_bounds = array<i64: 32, 16>}, {pipeline_mode = #tpu.pipeline_mode<synchronous>, transform_indices = @transform_6, window_bounds = array<i64: 4, 32>}, {transform_indices = @transform_7, window_bounds = array<i64: 4, 128>}]} {
    %c0 = arith.constant 0 : index
    %c0_0 = arith.constant 0 : index
    %0 = vector.load %arg1[%c0, %c0_0] : memref<8x128xf32, #tpu.memory_space<vmem>>, vector<8x128xf32>
    %cst = arith.constant 5.000000e-01 : f32
    %1 = vector.broadcast %cst : f32 to vector<8x128xf32>
    %2 = arith.mulf %0, %1 : vector<8x128xf32>
    %3 = math.cos %2 : vector<8x128xf32>
    %4 = math.sin %2 : vector<8x128xf32>
    %c0_1 = arith.constant 0 : index
    %c0_2 = arith.constant 0 : index
    %5 = vector.load %arg2[%c0_1, %c0_2] : memref<32x8xf32, #tpu.memory_space<vmem>>, vector<32x8xf32>
    %cst_3 = arith.constant dense<0.000000e+00> : vector<32x128xf32>
    %6 = tpu.matmul %5, %3, %cst_3 {dimension_numbers = #tpu.dot_dimension_numbers<[1], [0], [0], [1], [0, 0, 1, 1], [], []>} : vector<32x8xf32>, vector<8x128xf32>, vector<32x128xf32> -> vector<32x128xf32>
    %c0_4 = arith.constant 0 : index
    %c0_5 = arith.constant 0 : index
    %7 = vector.load %arg3[%c0_4, %c0_5] : memref<32x8xf32, #tpu.memory_space<vmem>>, vector<32x8xf32>
    %cst_6 = arith.constant dense<0.000000e+00> : vector<32x128xf32>
    %8 = tpu.matmul %7, %4, %cst_6 {dimension_numbers = #tpu.dot_dimension_numbers<[1], [0], [0], [1], [0, 0, 1, 1], [], []>} : vector<32x8xf32>, vector<8x128xf32>, vector<32x128xf32> -> vector<32x128xf32>
    %9 = vector.extract_strided_slice %6 {offsets = [0, 0], sizes = [16, 128], strides = [1, 1]} : vector<32x128xf32> to vector<16x128xf32>
    %10 = vector.extract_strided_slice %8 {offsets = [0, 0], sizes = [16, 128], strides = [1, 1]} : vector<32x128xf32> to vector<16x128xf32>
    %11 = arith.addf %9, %10 : vector<16x128xf32>
    %12 = vector.extract_strided_slice %6 {offsets = [16, 0], sizes = [16, 128], strides = [1, 1]} : vector<32x128xf32> to vector<16x128xf32>
    %13 = arith.mulf %11, %12 : vector<16x128xf32>
    %14 = vector.extract_strided_slice %8 {offsets = [16, 0], sizes = [16, 128], strides = [1, 1]} : vector<32x128xf32> to vector<16x128xf32>
    %15 = arith.mulf %11, %14 : vector<16x128xf32>
    %16 = vector.extract_strided_slice %13 {offsets = [0, 0], sizes = [8, 128], strides = [1, 1]} : vector<16x128xf32> to vector<8x128xf32>
    %17 = vector.extract_strided_slice %13 {offsets = [8, 0], sizes = [8, 128], strides = [1, 1]} : vector<16x128xf32> to vector<8x128xf32>
    %18 = vector.extract_strided_slice %15 {offsets = [0, 0], sizes = [8, 128], strides = [1, 1]} : vector<16x128xf32> to vector<8x128xf32>
    %19 = vector.extract_strided_slice %15 {offsets = [8, 0], sizes = [8, 128], strides = [1, 1]} : vector<16x128xf32> to vector<8x128xf32>
    %20 = arith.mulf %16, %17 : vector<8x128xf32>
    %21 = arith.mulf %18, %19 : vector<8x128xf32>
    %22 = arith.subf %20, %21 : vector<8x128xf32>
    %23 = arith.mulf %16, %19 : vector<8x128xf32>
    %24 = arith.mulf %18, %17 : vector<8x128xf32>
    %25 = arith.addf %23, %24 : vector<8x128xf32>
    %c0_7 = arith.constant 0 : index
    %c0_8 = arith.constant 0 : index
    %26 = vector.load %arg4[%c0_7, %c0_8] : memref<32x8xf32, #tpu.memory_space<vmem>>, vector<32x8xf32>
    %cst_9 = arith.constant dense<0.000000e+00> : vector<32x128xf32>
    %27 = tpu.matmul %26, %22, %cst_9 {dimension_numbers = #tpu.dot_dimension_numbers<[1], [0], [0], [1], [0, 0, 1, 1], [], []>} : vector<32x8xf32>, vector<8x128xf32>, vector<32x128xf32> -> vector<32x128xf32>
    %c0_10 = arith.constant 0 : index
    %c0_11 = arith.constant 0 : index
    %28 = vector.load %arg4[%c0_10, %c0_11] : memref<32x8xf32, #tpu.memory_space<vmem>>, vector<32x8xf32>
    %cst_12 = arith.constant dense<0.000000e+00> : vector<32x128xf32>
    %29 = tpu.matmul %28, %25, %cst_12 {dimension_numbers = #tpu.dot_dimension_numbers<[1], [0], [0], [1], [0, 0, 1, 1], [], []>} : vector<32x8xf32>, vector<8x128xf32>, vector<32x128xf32> -> vector<32x128xf32>
    %30 = vector.extract_strided_slice %27 {offsets = [0, 0], sizes = [16, 128], strides = [1, 1]} : vector<32x128xf32> to vector<16x128xf32>
    %31 = vector.extract_strided_slice %27 {offsets = [16, 0], sizes = [16, 128], strides = [1, 1]} : vector<32x128xf32> to vector<16x128xf32>
    %32 = arith.mulf %30, %31 : vector<16x128xf32>
    %33 = vector.extract_strided_slice %29 {offsets = [0, 0], sizes = [16, 128], strides = [1, 1]} : vector<32x128xf32> to vector<16x128xf32>
    %34 = vector.extract_strided_slice %29 {offsets = [16, 0], sizes = [16, 128], strides = [1, 1]} : vector<32x128xf32> to vector<16x128xf32>
    %35 = arith.mulf %33, %34 : vector<16x128xf32>
    %36 = arith.subf %32, %35 : vector<16x128xf32>
    %37 = vector.extract_strided_slice %27 {offsets = [0, 0], sizes = [16, 128], strides = [1, 1]} : vector<32x128xf32> to vector<16x128xf32>
    %38 = vector.extract_strided_slice %29 {offsets = [16, 0], sizes = [16, 128], strides = [1, 1]} : vector<32x128xf32> to vector<16x128xf32>
    %39 = arith.mulf %37, %38 : vector<16x128xf32>
    %40 = vector.extract_strided_slice %29 {offsets = [0, 0], sizes = [16, 128], strides = [1, 1]} : vector<32x128xf32> to vector<16x128xf32>
    %41 = vector.extract_strided_slice %27 {offsets = [16, 0], sizes = [16, 128], strides = [1, 1]} : vector<32x128xf32> to vector<16x128xf32>
    %42 = arith.mulf %40, %41 : vector<16x128xf32>
    %43 = arith.addf %39, %42 : vector<16x128xf32>
    %c0_13 = arith.constant 0 : index
    %c0_14 = arith.constant 0 : index
    %44 = vector.load %arg5[%c0_13, %c0_14] : memref<32x16xf32, #tpu.memory_space<vmem>>, vector<32x16xf32>
    %cst_15 = arith.constant dense<0.000000e+00> : vector<32x128xf32>
    %45 = tpu.matmul %44, %36, %cst_15 {dimension_numbers = #tpu.dot_dimension_numbers<[1], [0], [0], [1], [0, 0, 1, 1], [], []>} : vector<32x16xf32>, vector<16x128xf32>, vector<32x128xf32> -> vector<32x128xf32>
    %c0_16 = arith.constant 0 : index
    %c0_17 = arith.constant 0 : index
    %46 = vector.load %arg6[%c0_16, %c0_17] : memref<32x16xf32, #tpu.memory_space<vmem>>, vector<32x16xf32>
    %cst_18 = arith.constant dense<0.000000e+00> : vector<32x128xf32>
    %47 = tpu.matmul %46, %43, %cst_18 {dimension_numbers = #tpu.dot_dimension_numbers<[1], [0], [0], [1], [0, 0, 1, 1], [], []>} : vector<32x16xf32>, vector<16x128xf32>, vector<32x128xf32> -> vector<32x128xf32>
    %48 = arith.addf %45, %47 : vector<32x128xf32>
    %c0_19 = arith.constant 0 : index
    %c0_20 = arith.constant 0 : index
    %49 = vector.load %arg7[%c0_19, %c0_20] : memref<4x32xf32, #tpu.memory_space<vmem>>, vector<4x32xf32>
    %50 = arith.mulf %48, %48 : vector<32x128xf32>
    %cst_21 = arith.constant dense<0.000000e+00> : vector<4x128xf32>
    %51 = tpu.matmul %49, %50, %cst_21 {dimension_numbers = #tpu.dot_dimension_numbers<[1], [0], [0], [1], [0, 0, 1, 1], [], []>} : vector<4x32xf32>, vector<32x128xf32>, vector<4x128xf32> -> vector<4x128xf32>
    %c0_22 = arith.constant 0 : index
    %c0_23 = arith.constant 0 : index
    %52 = vector.load %arg8[%c0_22, %c0_23] : memref<4x128xf32, #tpu.memory_space<vmem>>, vector<4x128xf32>
    tpu.vector_store %arg8[%c0_22, %c0_23], %51 {strides = array<i32>} : memref<4x128xf32, #tpu.memory_space<vmem>>, vector<4x128xf32>,
    return
  }
  func.func @transform_0(%arg0: i32) -> (i32, i32) {
    %c0_i32 = arith.constant 0 : i32
    %c0_i32_0 = arith.constant 0 : i32
    return %c0_i32, %arg0 : i32, i32
  }
  func.func @transform_1(%arg0: i32) -> (i32, i32) {
    %c0_i32 = arith.constant 0 : i32
    %c0_i32_0 = arith.constant 0 : i32
    %c0_i32_1 = arith.constant 0 : i32
    return %c0_i32, %c0_i32_0 : i32, i32
  }
  func.func @transform_2(%arg0: i32) -> (i32, i32) {
    %c0_i32 = arith.constant 0 : i32
    %c0_i32_0 = arith.constant 0 : i32
    %c0_i32_1 = arith.constant 0 : i32
    return %c0_i32, %c0_i32_0 : i32, i32
  }
  func.func @transform_3(%arg0: i32) -> (i32, i32) {
    %c0_i32 = arith.constant 0 : i32
    %c0_i32_0 = arith.constant 0 : i32
    %c0_i32_1 = arith.constant 0 : i32
    return %c0_i32, %c0_i32_0 : i32, i32
  }
  func.func @transform_4(%arg0: i32) -> (i32, i32) {
    %c0_i32 = arith.constant 0 : i32
    %c0_i32_0 = arith.constant 0 : i32
    %c0_i32_1 = arith.constant 0 : i32
    return %c0_i32, %c0_i32_0 : i32, i32
  }
  func.func @transform_5(%arg0: i32) -> (i32, i32) {
    %c0_i32 = arith.constant 0 : i32
    %c0_i32_0 = arith.constant 0 : i32
    %c0_i32_1 = arith.constant 0 : i32
    return %c0_i32, %c0_i32_0 : i32, i32
  }
  func.func @transform_6(%arg0: i32) -> (i32, i32) {
    %c0_i32 = arith.constant 0 : i32
    %c0_i32_0 = arith.constant 0 : i32
    %c0_i32_1 = arith.constant 0 : i32
    return %c0_i32, %c0_i32_0 : i32, i32
  }
  func.func @transform_7(%arg0: i32) -> (i32, i32) {
    %c0_i32 = arith.constant 0 : i32
    %c0_i32_0 = arith.constant 0 : i32
    return %c0_i32, %arg0 : i32, i32
  }
}

</mosaic_0001>

<bundles_post_ra>
// kernel: tile.7
= control target key start
LH: loop header
LB: loop body
LE: loop exit
PB: predicated region body
PF: predicated region fallthrough
CT: control target
= control target key end

     0   :  { %vm42_vm0 = vcmask 1047556   ;;  %vm44_vm1 = vcmask 293888   ;;  %vm60_vm2 = vcmask 589088   ;;  %s157_s0 = inlined_call_operand.vmem [shape: f32[2,1,36,2,4], index: 0, kind: input, shape index: {}]   ;;  %s158_s1 = inlined_call_operand.vmem [shape: f32[72,4,2], index: 1, kind: output, shape index: {}]  }
   0x1   :  { %v99_v0 = vld [vmem:[%s157_s0 + $0xe] sm:$0x3]  ;;  %v100_v1 = vld [vmem:[%s157_s0 + $0xc] sm:$0x3]  ;;  %v101_v2 = vld [vmem:[%s157_s0 + $0xa] sm:$0x3] }
   0x2   :  { %8 = vst [vmem:[#allocation1 + $0x38] sm:$0x3] %v99_v0  ;;  %13 = vst [vmem:[#allocation1 + $0x30] sm:$0x3] %v100_v1  ;;  %v102_v3 = vld [vmem:[%s157_s0 + $0x8] sm:$0x3] }
   0x3   :  { %18 = vst [vmem:[#allocation1 + $0x28] sm:$0x3] %v101_v2  ;;  %v103_v4 = vld [vmem:[%s157_s0 + $0x6] sm:$0x3]  ;;  %v104_v5 = vld [vmem:[%s157_s0 + $0x4] sm:$0x3] }
   0x4   :  { %23 = vst [vmem:[#allocation1 + $0x20] sm:$0x3] %v102_v3  ;;  %28 = vst [vmem:[#allocation1 + $0x18] sm:$0x3] %v103_v4  ;;  %v105_v6 = vld [vmem:[%s157_s0 + $0x2] sm:$0x3] }
   0x5   :  { %33 = vst [vmem:[#allocation1 + $0x10] sm:$0x3] %v104_v5  ;;  %v38_v7 = vld [vmem:[%s157_s0] sm:$0x3]  ;;  %37 = vst [vmem:[#allocation1 + $0x8] sm:$0x3] %v105_v6 }
   0x6   :  { %39 = vst [vmem:[#allocation1] sm:$0x3] %v38_v7  ;;  %s110_s0 = smov 36  }
   0xb   :  { %v41_v8 = vld [vmem:[#allocation1] ss:$8 sm:$0xf0]   ;;  %v55_v9 = vld [vmem:[#allocation1 + $0x1] ss:$8 sm:$0xf0]  }
   0xd   :  { %v40_v10 = vld [vmem:[#allocation1] ss:$8 sm:$0xf]   ;;  %v53_v11 = vld [vmem:[#allocation1 + $0x1] ss:$8 sm:$0xf]  }
   0xe   :  { %v43_v12 = vsel %vm42_vm0, %v41_v8, %v40_v10  ;;  %v57_v13 = vsel %vm42_vm0, %v55_v9, %v53_v11 }
   0xf   :  { %58 = vrot.lane.b32.xlu0 %v57_v13, %s110_s0  ;;  %45 = vst.msk [vmem:[#allocation0] sm:$0x3] %vm44_vm1, %v43_v12   ;;  %47 = vst.msk [vmem:[#allocation0 + $0x6] sm:$0xc] %vm44_vm1, %v43_v12  }
  0x10   :  { %49 = vst.msk [vmem:[#allocation0 + $0xc] sm:$0x30] %vm44_vm1, %v43_v12   ;;  %51 = vst.msk [vmem:[#allocation0 + $0x12] sm:$0xc0] %vm44_vm1, %v43_v12  }
  0x81   :  { %v59_v14 = vpop.permute.xlu0 %58  }
  0x82   :  { %61 = vst.msk [vmem:[#allocation0] sm:$0x3] %vm60_vm2, %v59_v14   ;;  %63 = vst.msk [vmem:[#allocation0 + $0x6] sm:$0xc] %vm60_vm2, %v59_v14  }
  0x83   :  { %65 = vst.msk [vmem:[#allocation0 + $0xc] sm:$0x30] %vm60_vm2, %v59_v14   ;;  %67 = vst.msk [vmem:[#allocation0 + $0x12] sm:$0xc0] %vm60_vm2, %v59_v14  }
  0x89   :  { %v71_v15 = vld [vmem:[#allocation0] sm:$0x3]  ;;  %v75_v16 = vld [vmem:[#allocation0 + $0x8] sm:$0x3] }
  0x8a   :  { %v80_v17 = vld [vmem:[#allocation0 + $0x10] sm:$0x3]  ;;  %73 = vst [vmem:[%s158_s1] sm:$0x3] %v71_v15  ;;  %106 = vst [vmem:[%s158_s1 + $0x2] sm:$0x3] %v75_v16 }
  0x8b   :  { %107 = vst [vmem:[%s158_s1 + $0x4] sm:$0x3] %v80_v17  ;;  %v86_v18 = vld [vmem:[#allocation0 + $0x18] sm:$0x3] }
  0x8c   :  { %108 = vst [vmem:[%s158_s1 + $0x6] sm:$0x3] %v86_v18 }

// kernel: sin.9
= control target key start
LH: loop header
LB: loop body
LE: loop exit
PB: predicated region body
PF: predicated region fallthrough
CT: control target
= control target key end

     0   :  { %v126_v12 = vmov 683565275   ;;  %v127_v14 = vmov 2475754826   ;;  %v128_v16 = vmov 2131351028   ;;  %s169_s0 = inlined_call_operand.vmem [shape: f32[16], index: 0, kind: input, shape index: {}]   ;;  %s170_s1 = inlined_call_operand.vmem [shape: f32[16], index: 1, kind: output, shape index: {}]  }
   0x1   :  { %v145_v0 = vld [vmem:[%s169_s0] sm:$0x1]  ;;  %v129_v18 = vmov 2102212464   ;;  %v130_v20 = vmov 920167782  }
   0x2   :  { %v6_v1 = vand.u32 2139095040, %v145_v0  ;;  %v3_v3 = vand.u32 2147483647, %v145_v0  ;;  %v131_v27 = vmov 1326507024   ;;  %vm5_vm7 = vcmp.lt.s32.totalorder %v145_v0, 0 }
   0x3   :  { %vm95_vm12 = vweird.f32 %v145_v0 }
   0x4   :  { %v7_v2 = vshrl.u32 %v6_v1, 23  ;;  %v10_v6 = vand.u32 8388607, %v3_v3  ;;  %vm4_vm8 = vcmp.le.f32.partialorder %v3_v3, 0.7853982 }
   0x6   :  { %v108_v4 = vadd.s32 4294967169, %v7_v2  ;;  %v11_v9 = vor.u32 8388608, %v10_v6 }
   0x8   :  { %v13_v5 = vadd.s32 1, %v108_v4  ;;  %v51_v29 = vshll.u32 %v11_v9, 8 }
   0xa   :  { %vm14_vm0 = vcmp.gt.s32.totalorder %v13_v5, 0 }
   0xb   :  { %v15_v7 = vsel %vm14_vm0, %v13_v5, 0 }
   0xc   :  { %v17_v8 = vand.u32 31, %v15_v7  ;;  %v16_v10 = vshrl.u32 %v15_v7, 5 }
   0xe   :  { %v18_v11 = vsub.s32 32, %v17_v8  ;;  %v20_v13 = vshll.u32 %v126_v12, %v17_v8  ;;  %v23_v15 = vshll.u32 %v127_v14, %v17_v8  ;;  %v26_v17 = vshll.u32 %v128_v16, %v17_v8 }
   0xf   :  { %v29_v19 = vshll.u32 %v129_v18, %v17_v8  ;;  %v32_v21 = vshll.u32 %v130_v20, %v17_v8  ;;  %vm35_vm1 = vcmp.lt.s32.totalorder %v16_v10, 1  ;;  %vm38_vm2 = vcmp.lt.s32.totalorder %v16_v10, 4 }
  0x10   :  { %v19_v22 = vshrl.u32 %v126_v12, %v18_v11  ;;  %v21_v23 = vshrl.u32 %v127_v14, %v18_v11  ;;  %v24_v24 = vshrl.u32 %v128_v16, %v18_v11  ;;  %v27_v25 = vshrl.u32 %v129_v18, %v18_v11 }
  0x11   :  { %v30_v26 = vshrl.u32 %v130_v20, %v18_v11  ;;  %v33_v28 = vshrl.u32 %v131_v27, %v18_v11  ;;  %vm36_vm3 = vcmp.lt.s32.totalorder %v16_v10, 2  ;;  %vm37_vm4 = vcmp.lt.s32.totalorder %v16_v10, 3 }
  0x12   :  { %v22_v30 = vor.u32 %v21_v23, %v20_v13  ;;  %v25_v31 = vor.u32 %v24_v24, %v23_v15  ;;  %v28_v32 = vor.u32 %v27_v25, %v26_v17 }
  0x13   :  { %v31_v33 = vor.u32 %v30_v26, %v29_v19  ;;  %v34_v34 = vor.u32 %v33_v28, %v32_v21 }
  0x14   :  { %v39_v35 = vsel %vm35_vm1, %v19_v22, %v22_v30  ;;  %v40_v36 = vsel %vm38_vm2, %v28_v32, 2102212464  ;;  %v43_v37 = vsel %vm35_vm1, %v22_v30, %v25_v31  ;;  %v47_v38 = vsel %vm35_vm1, %v25_v31, %v28_v32 }
  0x15   :  { %v41_v39 = vsel %vm37_vm4, %v25_v31, %v40_v36  ;;  %v44_v40 = vsel %vm38_vm2, %v31_v33, 920167782  ;;  %v48_v41 = vsel %vm38_vm2, %v34_v34, 1326507024 }
  0x16   :  { %v45_v42 = vsel %vm37_vm4, %v28_v32, %v44_v40  ;;  %v49_v43 = vsel %vm37_vm4, %v31_v33, %v48_v41  ;;  %v42_v44 = vsel %vm36_vm3, %v39_v35, %v41_v39 }
  0x17   :  { %v46_v45 = vsel %vm36_vm3, %v43_v37, %v45_v42  ;;  %v50_v46 = vsel %vm36_vm3, %v47_v38, %v49_v43  ;;  %v58_v51 = vmul.u32 %v51_v29, %v42_v44 }
  0x18   :  { %v151_v47 = vmul.u32.u64.low %v51_v29, %v50_v46  ;;  %v152_v48 = vmul.u32.u64.high %v51_v29, %v50_v46, %v151_v47  ;;  %v154_v49 = vmul.u32.u64.low %v51_v29, %v46_v45  ;;  %v155_v50 = vmul.u32.u64.high %v51_v29, %v46_v45, %v154_v49 }
  0x1a   :  { %vm60_vm5 = vc.u32 %v152_v48, %v154_v49  ;;  %v61_v52 = vadd.s32 1, %v155_v50  ;;  %v59_v63 = vadd.s32 %v154_v49, %v152_v48 }
  0x1c   :  { %v62_v53 = vsel %vm60_vm5, %v61_v52, %v155_v50 }
  0x1d   :  { %v63_v54 = vadd.s32 %v62_v53, %v58_v51 }
  0x1f   :  { %v64_v55 = vadd.s32 536870912, %v63_v54 }
  0x21   :  { %v65_v56 = vshrl.u32 %v64_v55, 30 }
  0x23   :  { %v66_v57 = vshll.u32 %v65_v56, 30  ;;  %v89_v13 = vsub.s32 4, %v65_v56 }
  0x25   :  { %v67_v58 = vsub.s32 %v63_v54, %v66_v57  ;;  %v90_v15 = vsel %vm5_vm7, %v89_v13, %v65_v56 }
  0x26   :  { %v92_v18 = vsel %vm4_vm8, 0, %v90_v15 }
  0x27   :  { %v69_v59 = vsub.s32 0, %v67_v58  ;;  %v96_v19 = vadd.s32 3, %v92_v18 }
  0x29   :  { %v109_v60 = vmin.u32 %v69_v59, %v67_v58  ;;  %v97_v20 = vand.u32 3, %v96_v19 }
  0x2b   :  { %v71_v61 = vclz %v109_v60  ;;  %vm102_vm9 = vcmp.eq.s32.totalorder %v97_v20, 2  ;;  %vm99_vm10 = vcmp.eq.s32.totalorder %v97_v20, 0  ;;  %vm98_vm11 = vcmp.lt.s32.totalorder %v97_v20, 2 }
  0x2d   :  { %v110_v62 = vadd.s32 4294967294, %v71_v61 }
  0x2f   :  { %vm111_vm6 = vcmp.lt.s32.totalorder %v110_v62, 0 }
  0x30   :  { %v74_v1 = vsel %vm111_vm6, 0, %v110_v62 }
  0x31   :  { %v75_v2 = vsub.s32 32, %v74_v1  ;;  %v76_v4 = vshll.u32 %v67_v58, %v74_v1  ;;  %v79_v5 = vsub.s32 4294967266, %v74_v1 }
  0x33   :  { %v77_v6 = vshrl.u32 %v59_v63, %v75_v2  ;;  %v80_v7 = vadd.s32 127, %v79_v5 }
  0x35   :  { %v78_v8 = vor.u32 %v77_v6, %v76_v4  ;;  %v81_v9 = vshll.u32 %v80_v7, 23 }
  0x37   :  { %v82_v10 = vor.u32 4788187, %v81_v9  ;;  %v85_v11 = vcvt.s32.f32 %v78_v8 }
  0x39   :  { %v83_v12 = vand.u32 2147483647, %v82_v10 }
  0x3b   :  { %v86_v14 = vmul.f32 %v85_v11, %v83_v12 }
  0x3d   :  { %v87_v3 = vxor.u32 2147483648, %v86_v14 }
  0x3f   :  { %v88_v16 = vsel %vm5_vm7, %v87_v3, %v86_v14 }
  0x40   :  { %v91_v17 = vsel %vm4_vm8, %v145_v0, %v88_v16 }
  0x41   :  { %122 = vcosq.f32 %v91_v17 }
  0x42   :  { %124 = vsinq.f32 %v91_v17 }
  0x4b   :  { %v123_v21 = vpop.eup %122 }
  0x4c   :  { %v125_v22 = vpop.eup %124  ;;  %v103_v23 = vxor.u32 2147483648, %v123_v21 }
  0x4d   :  { %v100_v24 = vxor.u32 2147483648, %v125_v22 }
  0x4e   :  { %v104_v0 = vsel %vm102_vm9, %v103_v23, %v125_v22 }
  0x4f   :  { %v101_v25 = vsel %vm99_vm10, %v123_v21, %v100_v24 }
  0x50   :  { %v105_v26 = vsel %vm98_vm11, %v101_v25, %v104_v0 }
  0x51   :  { %v106_v27 = vsel %vm95_vm12, nan, %v105_v26 }
  0x52   :  { %107 = vst [vmem:[%s170_s1] sm:$0x1] %v106_v27 }

// kernel: quanv2d_forward.1
= control target key start
LH: loop header
LB: loop body
LE: loop exit
PB: predicated region body
PF: predicated region fallthrough
CT: control target
= control target key end

     0   :  { %vm239_vm0 = vcmask 64512   ;;  %v1105_v15 = vmov 683565275   ;;  %v1106_v17 = vmov 2475754826   ;;  %s1268_s0 = inlined_call_operand.vmem [shape: f32[8,128], index: 0, kind: input, shape index: {}]   ;;  %s1269_s1 = inlined_call_operand.vmem [shape: f32[32,8], index: 1, kind: input, shape index: {}]   ;;  %s1270_s2 = inlined_call_operand.vmem [shape: f32[32,8], index: 2, kind: input, shape index: {}]   ;;  %s1271_s3 = inlined_call_operand.vmem [shape: f32[32,8], index: 3, kind: input, shape index: {}]   ;;  %s1272_s5 = inlined_call_operand.vmem [shape: f32[32,16], index: 5, kind: input, shape index: {}]   ;;  %s1273_s4 = inlined_call_operand.vmem [shape: f32[32,16], index: 4, kind: input, shape index: {}]   ;;  %s1274_s6 = inlined_call_operand.vmem [shape: f32[4,32], index: 6, kind: input, shape index: {}]   ;;  %s1275_s7 = inlined_call_operand.vmem [shape: f32[4,128], index: 7, kind: output, shape index: {}]  }
   0x1   :  { %v26_v0 = vld [vmem:[%s1268_s0] sm:$0xff]  ;;  %v1107_v19 = vmov 2131351028   ;;  %v1108_v21 = vmov 2102212464  }
   0x2   :  { %v235_v1 = vld [vmem:[%s1269_s1] sm:$0xff]  ;;  %v1160_v2 = vmul.f32 0.5, %v26_v0  ;;  %v1109_v23 = vmov 920167782   ;;  %v1110_v30 = vmov 1326507024  }
   0x3   :  { %v337_v3 = vld [vmem:[%s1270_s2] sm:$0xff]  ;;  %1007 = vmatprep.mubr.msk.f32.mxu1 %vm239_vm0, %v235_v1 }
   0x4   :  { %1015 = vmatprep.mubr.msk.f32.mxu0 %vm239_vm0, %v337_v3  ;;  %v31_v4 = vand.u32 2139095040, %v1160_v2  ;;  %v28_v6 = vand.u32 2147483647, %v1160_v2  ;;  %vm30_vm8 = vcmp.lt.s32.totalorder %v1160_v2, 0 }
   0x6   :  { %v32_v5 = vshrl.u32 %v31_v4, 23  ;;  %v35_v9 = vand.u32 8388607, %v28_v6  ;;  %vm29_vm9 = vcmp.le.f32.partialorder %v28_v6, 0.7853982 }
   0x8   :  { %v935_v7 = vadd.s32 4294967169, %v32_v5  ;;  %v36_v12 = vor.u32 8388608, %v35_v9 }
   0xa   :  { %v38_v8 = vadd.s32 1, %v935_v7  ;;  %v76_v32 = vshll.u32 %v36_v12, 8 }
   0xc   :  { %vm39_vm1 = vcmp.gt.s32.totalorder %v38_v8, 0 }
   0xd   :  { %v40_v10 = vsel %vm39_vm1, %v38_v8, 0  ;;  %vm120_vm1 = vweird.f32 %v1160_v2 }
   0xe   :  { %v42_v11 = vand.u32 31, %v40_v10  ;;  %v41_v13 = vshrl.u32 %v40_v10, 5 }
  0x10   :  { %v43_v14 = vsub.s32 32, %v42_v11  ;;  %v45_v16 = vshll.u32 %v1105_v15, %v42_v11  ;;  %v48_v18 = vshll.u32 %v1106_v17, %v42_v11  ;;  %v51_v20 = vshll.u32 %v1107_v19, %v42_v11 }
  0x11   :  { %v54_v22 = vshll.u32 %v1108_v21, %v42_v11  ;;  %v57_v24 = vshll.u32 %v1109_v23, %v42_v11  ;;  %vm60_vm2 = vcmp.lt.s32.totalorder %v41_v13, 1  ;;  %vm63_vm3 = vcmp.lt.s32.totalorder %v41_v13, 4 }
  0x12   :  { %v44_v25 = vshrl.u32 %v1105_v15, %v43_v14  ;;  %v46_v26 = vshrl.u32 %v1106_v17, %v43_v14  ;;  %v49_v27 = vshrl.u32 %v1107_v19, %v43_v14  ;;  %v52_v28 = vshrl.u32 %v1108_v21, %v43_v14 }
  0x13   :  { %v55_v29 = vshrl.u32 %v1109_v23, %v43_v14  ;;  %v58_v31 = vshrl.u32 %v1110_v30, %v43_v14  ;;  %vm61_vm4 = vcmp.lt.s32.totalorder %v41_v13, 2  ;;  %vm62_vm5 = vcmp.lt.s32.totalorder %v41_v13, 3 }
  0x14   :  { %v47_v33 = vor.u32 %v46_v26, %v45_v16  ;;  %v50_v34 = vor.u32 %v49_v27, %v48_v18  ;;  %v53_v35 = vor.u32 %v52_v28, %v51_v20 }
  0x15   :  { %v56_v36 = vor.u32 %v55_v29, %v54_v22  ;;  %v59_v37 = vor.u32 %v58_v31, %v57_v24 }
  0x16   :  { %v64_v38 = vsel %vm60_vm2, %v44_v25, %v47_v33  ;;  %v65_v39 = vsel %vm63_vm3, %v53_v35, 2102212464  ;;  %v68_v40 = vsel %vm60_vm2, %v47_v33, %v50_v34  ;;  %v72_v41 = vsel %vm60_vm2, %v50_v34, %v53_v35 }
  0x17   :  { %v66_v42 = vsel %vm62_vm5, %v50_v34, %v65_v39  ;;  %v69_v43 = vsel %vm63_vm3, %v56_v36, 920167782  ;;  %v73_v44 = vsel %vm63_vm3, %v59_v37, 1326507024  ;;  %v236_v37 = vld [vmem:[%s1269_s1 + $0x8] sm:$0xff]  ;;  %v339_v39 = vld [vmem:[%s1270_s2 + $0x10] sm:$0xff] }
  0x18   :  { %v70_v45 = vsel %vm62_vm5, %v53_v35, %v69_v43  ;;  %v74_v46 = vsel %vm62_vm5, %v56_v36, %v73_v44  ;;  %v67_v47 = vsel %vm61_vm4, %v64_v38, %v66_v42  ;;  %v338_v38 = vld [vmem:[%s1270_s2 + $0x8] sm:$0xff]  ;;  %v450_v42 = vld [vmem:[%s1271_s3] sm:$0xff]  ;;  %vm656_vm2 = vcmask 130048  }
  0x19   :  { %v71_v48 = vsel %vm61_vm4, %v68_v40, %v70_v45  ;;  %v75_v49 = vsel %vm61_vm4, %v72_v41, %v74_v46  ;;  %v83_v54 = vmul.u32 %v76_v32, %v67_v47  ;;  %v238_v40 = vld [vmem:[%s1269_s1 + $0x18] sm:$0xff]  ;;  %vm856_vm3 = vcmask 261120  }
  0x1a   :  { %v1171_v50 = vmul.u32.u64.low %v76_v32, %v75_v49  ;;  %v1172_v51 = vmul.u32.u64.high %v76_v32, %v75_v49, %v1171_v50  ;;  %v1174_v52 = vmul.u32.u64.low %v76_v32, %v71_v48  ;;  %v1175_v53 = vmul.u32.u64.high %v76_v32, %v71_v48, %v1174_v52  ;;  %v340_v41 = vld [vmem:[%s1270_s2 + $0x18] sm:$0xff] }
  0x1c   :  { %vm85_vm6 = vc.u32 %v1172_v51, %v1174_v52  ;;  %v86_v55 = vadd.s32 1, %v1175_v53  ;;  %v84_v3 = vadd.s32 %v1174_v52, %v1172_v51 }
  0x1e   :  { %v87_v56 = vsel %vm85_vm6, %v86_v55, %v1175_v53 }
  0x1f   :  { %v88_v57 = vadd.s32 %v87_v56, %v83_v54 }
  0x21   :  { %v89_v58 = vadd.s32 536870912, %v88_v57 }
  0x23   :  { %v90_v59 = vshrl.u32 %v89_v58, 30 }
  0x25   :  { %v91_v60 = vshll.u32 %v90_v59, 30  ;;  %v114_v16 = vsub.s32 4, %v90_v59 }
  0x27   :  { %v92_v61 = vsub.s32 %v88_v57, %v91_v60  ;;  %v115_v19 = vsel %vm30_vm8, %v114_v16, %v90_v59 }
  0x28   :  { %v117_v22 = vsel %vm29_vm9, 0, %v115_v19 }
  0x29   :  { %v94_v62 = vsub.s32 0, %v92_v61  ;;  %v224_v23 = vadd.s32 3, %v117_v22  ;;  %v121_v24 = vand.u32 3, %v117_v22 }
  0x2b   :  { %v936_v63 = vmin.u32 %v94_v62, %v92_v61  ;;  %v225_v25 = vand.u32 3, %v224_v23  ;;  %vm126_vm10 = vcmp.eq.s32.totalorder %v121_v24, 2  ;;  %vm123_vm12 = vcmp.eq.s32.totalorder %v121_v24, 0 }
  0x2c   :  { %vm122_vm14 = vcmp.lt.s32.totalorder %v121_v24, 2 }
  0x2d   :  { %v96_v0 = vclz %v936_v63  ;;  %vm230_vm11 = vcmp.eq.s32.totalorder %v225_v25, 2  ;;  %vm227_vm13 = vcmp.eq.s32.totalorder %v225_v25, 0  ;;  %vm226_vm15 = vcmp.lt.s32.totalorder %v225_v25, 2  ;;  %v451_v63 = vld [vmem:[%s1271_s3 + $0x8] sm:$0xff] }
  0x2f   :  { %v937_v1 = vadd.s32 4294967294, %v96_v0  ;;  %v452_v0 = vld [vmem:[%s1271_s3 + $0x10] sm:$0xff] }
  0x31   :  { %vm938_vm7 = vcmp.lt.s32.totalorder %v937_v1, 0 }
  0x32   :  { %v99_v4 = vsel %vm938_vm7, 0, %v937_v1  ;;  %v453_v1 = vld [vmem:[%s1271_s3 + $0x18] sm:$0xff] }
  0x33   :  { %v100_v5 = vsub.s32 32, %v99_v4  ;;  %v101_v7 = vshll.u32 %v92_v61, %v99_v4  ;;  %v104_v8 = vsub.s32 4294967266, %v99_v4 }
  0x35   :  { %v102_v9 = vshrl.u32 %v84_v3, %v100_v5  ;;  %v105_v10 = vadd.s32 127, %v104_v8  ;;  %v652_v3 = vld [vmem:[%s1272_s5] sm:$0xff] }
  0x37   :  { %v103_v11 = vor.u32 %v102_v9, %v101_v7  ;;  %v106_v12 = vshll.u32 %v105_v10, 23 }
  0x39   :  { %v107_v13 = vor.u32 4788187, %v106_v12  ;;  %v110_v14 = vcvt.s32.f32 %v103_v11 }
  0x3b   :  { %v108_v15 = vand.u32 2147483647, %v107_v13 }
  0x3d   :  { %v111_v17 = vmul.f32 %v110_v14, %v108_v15 }
  0x3f   :  { %v112_v18 = vxor.u32 2147483648, %v111_v17 }
  0x41   :  { %v113_v20 = vsel %vm30_vm8, %v112_v18, %v111_v17 }
  0x42   :  { %v116_v21 = vsel %vm29_vm9, %v1160_v2, %v113_v20  ;;  %v237_v2 = vld [vmem:[%s1269_s1 + $0x10] sm:$0xff] }
  0x43   :  { %1101 = vcosq.f32 %v116_v21 }
  0x44   :  { %1103 = vsinq.f32 %v116_v21 }
  0x4d   :  { %v1102_v26 = vpop.eup %1101 }
  0x4e   :  { %v1104_v27 = vpop.eup %1103  ;;  %v127_v28 = vxor.u32 2147483648, %v1102_v26 }
  0x4f   :  { %v124_v6 = vxor.u32 2147483648, %v1104_v27 }
  0x50   :  { %v128_v29 = vsel %vm126_vm10, %v127_v28, %v1104_v27  ;;  %v232_v30 = vsel %vm230_vm11, %v127_v28, %v1104_v27  ;;  %v653_v27 = vld [vmem:[%s1272_s5 + $0x8] sm:$0xff]  ;;  %v654_v28 = vld [vmem:[%s1272_s5 + $0x10] sm:$0xff] }
  0x51   :  { %v125_v31 = vsel %vm123_vm12, %v1102_v26, %v124_v6  ;;  %v229_v32 = vsel %vm227_vm13, %v1102_v26, %v124_v6  ;;  %v655_v6 = vld [vmem:[%s1272_s5 + $0x18] sm:$0xff] }
  0x52   :  { %v129_v33 = vsel %vm122_vm14, %v125_v31, %v128_v29  ;;  %v233_v34 = vsel %vm226_vm15, %v229_v32, %v232_v30  ;;  %v648_v29 = vld [vmem:[%s1273_s4] sm:$0xff]  ;;  %v649_v30 = vld [vmem:[%s1273_s4 + $0x8] sm:$0xff]  ;;  %v650_v31 = vld [vmem:[%s1273_s4 + $0x10] sm:$0xff] }
  0x53   :  { %v130_v35 = vsel %vm120_vm1, nan, %v129_v33  ;;  %v234_v36 = vsel %vm120_vm1, nan, %v233_v34  ;;  %v651_v32 = vld [vmem:[%s1273_s4 + $0x18] sm:$0xff]  ;;  %v1111_v33 = vmov 0.0|0.0   ;;  %v1113_v34 = vmov 0.0  }
  0x54   :  { %1005 = vmatprep.subr.mxu1 %v130_v35  ;;  %1013 = vmatprep.subr.mxu0 %v234_v36 }
  0x55   :  { %1006 = vmatpush3.msra.mxu1 %v130_v35  ;;  %1014 = vmatpush3.msra.mxu0 %v234_v36 }
  0x56   :  { %1008 = vmatmul.mubr.msk.f32.vlgmr.msra.gmra.mrb[0].mxu1 %vm239_vm0, %v236_v37  ;;  %1016 = vmatmul.mubr.msk.f32.vlgmr.msra.gmra.mrb[0].mxu0 %vm239_vm0, %v338_v38 }
  0x57   :  { %1010 = vmatprep.mubr.msk.f32.mxu1 %vm239_vm0, %v237_v2  ;;  %1018 = vmatprep.mubr.msk.f32.mxu0 %vm239_vm0, %v339_v39 }
  0x5a   :  { %1011 = vmatmul.mubr.msk.f32.gmra.mrb[2].mxu1 %vm239_vm0, %v238_v40  ;;  %1019 = vmatmul.mubr.msk.f32.gmra.mrb[2].mxu0 %vm239_vm0, %v340_v41 }
  0x5b   :  { %1023 = vmatprep.mubr.msk.f32.mxu1 %vm239_vm0, %v450_v42  ;;  %1041 = vmatprep.mubr.msk.f32.mxu0 %vm656_vm2, %v652_v3 }
 0x129   :  { %v1009_v43 = vpop.f32.mrb[0].mxu1  ;;  %v1017_v44 = vpop.f32.mrb[0].mxu0 }
 0x12a   :  { %v439_v45 = vadd.f32 %v1017_v44, %v1009_v43  ;;  %v318_v46 = vpop.f32.mrb[1].mxu1  ;;  %v419_v47 = vpop.f32.mrb[1].mxu0  ;;  %v851_v44 = vld [vmem:[%s1274_s6] sm:$0xf] }
 0x12b   :  { %v438_v48 = vadd.f32 %v419_v47, %v318_v46 }
 0x12d   :  { %v1012_v49 = vpop.f32.mrb[2].mxu1  ;;  %v1020_v50 = vpop.f32.mrb[2].mxu0 }
 0x12e   :  { %v441_v51 = vmul.f32 %v1012_v49, %v439_v45  ;;  %v443_v52 = vmul.f32 %v1020_v50, %v439_v45  ;;  %v328_v53 = vpop.f32.mrb[3].mxu1  ;;  %v429_v54 = vpop.f32.mrb[3].mxu0 }
 0x12f   :  { %v440_v55 = vmul.f32 %v438_v48, %v328_v53  ;;  %v442_v56 = vmul.f32 %v438_v48, %v429_v54 }
 0x131   :  { %v444_v57 = vmul.f32 %v441_v51, %v440_v55  ;;  %v447_v58 = vmul.f32 %v443_v52, %v440_v55  ;;  %v445_v59 = vmul.f32 %v443_v52, %v442_v56  ;;  %v448_v60 = vmul.f32 %v442_v56, %v441_v51 }
 0x133   :  { %v446_v61 = vsub.f32 %v444_v57, %v445_v59  ;;  %v449_v62 = vadd.f32 %v448_v60, %v447_v58 }
 0x135   :  { %1021 = vmatprep.subr.mxu1 %v446_v61 }
 0x136   :  { %1022 = vmatpush3.msra.mxu1 %v446_v61 }
 0x137   :  { %1024 = vmatmul.mubr.msk.f32.vlgmr.msra.gmra.mrb[4].mxu1 %vm239_vm0, %v451_v63  ;;  %1029 = vmatprep.subr.mxu1 %v449_v62 }
 0x138   :  { %1030 = vmatpush3.msra.mxu1 %v449_v62  ;;  %1026 = vmatprep.mubr.msk.f32.mxu1 %vm239_vm0, %v452_v0 }
 0x139   :  { %1076 = vmatprep.subr.bf16.mxu1 %v1111_v33 }
 0x13b   :  { %1027 = vmatmul.mubr.msk.f32.gmra.mrb[6].mxu1 %vm239_vm0, %v453_v1 }
 0x13c   :  { %1031 = vmatprep.mubr.msk.f32.mxu1 %vm239_vm0, %v450_v42 }
 0x13f   :  { %1032 = vmatmul.mubr.msk.f32.vlgmr.msra.gmra.mrb[8].mxu1 %vm239_vm0, %v451_v63 }
 0x140   :  { %1034 = vmatprep.mubr.msk.f32.mxu1 %vm239_vm0, %v452_v0 }
 0x143   :  { %1035 = vmatmul.mubr.msk.f32.gmra.mrb[10].mxu1 %vm239_vm0, %v453_v1  ;;  %vm1112_vm0 = vmmov 0  }
 0x144   :  { %1065 = vmatprep.mubr.msk.f32.mxu1 %vm1112_vm0, %v1113_v34 }
 0x20a   :  { %v1025_v4 = vpop.f32.mrb[4].mxu1 }
 0x20b   :  { %v532_v5 = vpop.f32.mrb[5].mxu1 }
 0x20e   :  { %v1028_v7 = vpop.f32.mrb[6].mxu1 }
 0x20f   :  { %v637_v8 = vmul.f32 %v1028_v7, %v1025_v4  ;;  %v542_v9 = vpop.f32.mrb[7].mxu1 }
 0x210   :  { %v636_v10 = vmul.f32 %v542_v9, %v532_v5 }
 0x212   :  { %v1033_v11 = vpop.f32.mrb[8].mxu1 }
 0x213   :  { %v645_v12 = vmul.f32 %v1033_v11, %v1028_v7  ;;  %v617_v13 = vpop.f32.mrb[9].mxu1 }
 0x214   :  { %v644_v14 = vmul.f32 %v617_v13, %v542_v9 }
 0x216   :  { %v1036_v15 = vpop.f32.mrb[10].mxu1 }
 0x217   :  { %v639_v16 = vmul.f32 %v1036_v15, %v1033_v11  ;;  %v643_v17 = vmul.f32 %v1036_v15, %v1025_v4  ;;  %v627_v18 = vpop.f32.mrb[11].mxu1 }
 0x218   :  { %v638_v19 = vmul.f32 %v627_v18, %v617_v13  ;;  %v642_v20 = vmul.f32 %v627_v18, %v532_v5 }
 0x219   :  { %v641_v21 = vsub.f32 %v637_v8, %v639_v16  ;;  %v647_v22 = vadd.f32 %v645_v12, %v643_v17 }
 0x21a   :  { %v640_v23 = vsub.f32 %v636_v10, %v638_v19  ;;  %v646_v24 = vadd.f32 %v644_v14, %v642_v20 }
 0x21c   :  { %v1068_v25 = vpack.c.bf16 %v647_v22, %v646_v24  ;;  %v1072_v26 = vpack.c.bf16 %v641_v21, %v640_v23 }
 0x21e   :  { %1069 = vmatprep.subr.bf16.mxu0 %v1068_v25 }
 0x21f   :  { %1071 = vmatpush3.bf16.msra.mxu0 %v1068_v25 }
 0x220   :  { %1073 = vmatprep.subr.bf16.mxu0 %v1072_v26 }
 0x222   :  { %1042 = vmatmul.mubr.msk.f32.vlgmr.msra.gmra.mrb[4].mxu0 %vm656_vm2, %v653_v27 }
 0x223   :  { %1075 = vmatpush3.bf16.msra.mxu0 %v1072_v26  ;;  %1044 = vmatprep.mubr.msk.f32.mxu0 %vm656_vm2, %v654_v28 }
 0x226   :  { %1045 = vmatmul.mubr.msk.f32.gmra.mrb[6].mxu0 %vm656_vm2, %v655_v6 }
 0x227   :  { %1051 = vmatprep.mubr.msk.f32.mxu0 %vm656_vm2, %v648_v29 }
 0x22a   :  { %1052 = vmatmul.mubr.msk.f32.vlgmr.msra.gmra.mrb[4].mxu0 %vm656_vm2, %v649_v30 }
 0x22b   :  { %1054 = vmatprep.mubr.msk.f32.mxu0 %vm656_vm2, %v650_v31 }
 0x22e   :  { %1055 = vmatmul.mubr.msk.f32.gmra.mrb[6].mxu0 %vm656_vm2, %v651_v32 }
 0x2fd   :  { %v1053_v35 = vpop.f32.mrb[4].mxu0 }
 0x2fe   :  { %v853_v36 = vmul.f32 %v1053_v35, %v1053_v35  ;;  %v832_v37 = vpop.f32.mrb[5].mxu0 }
 0x2ff   :  { %v852_v38 = vmul.f32 %v832_v37, %v832_v37 }
 0x301   :  { %v1077_v2 = vpack.c.bf16 %v853_v36, %v852_v38  ;;  %v1056_v39 = vpop.f32.mrb[6].mxu0 }
 0x302   :  { %v855_v40 = vmul.f32 %v1056_v39, %v1056_v39  ;;  %v842_v41 = vpop.f32.mrb[7].mxu0 }
 0x303   :  { %v854_v42 = vmul.f32 %v842_v41, %v842_v41  ;;  %1078 = vmatpush3.bf16.msra.mxu1 %v1077_v2 }
 0x304   :  { %1079 = vmatprep.subr.bf16.mxu1 %v1111_v33 }
 0x305   :  { %v1080_v43 = vpack.c.bf16 %v855_v40, %v854_v42 }
 0x307   :  { %1081 = vmatpush3.bf16.msra.mxu1 %v1080_v43 }
 0x30a   :  { %1066 = vmatmul.mubr.msk.f32.vlgmr.msra.gmra.mrb[12].mxu1 %vm856_vm3, %v851_v44 }
 0x3dd   :  { %v926_v45 = vpop.f32.mrb[12].mxu1 }
 0x3de   :  { %930 = vst [vmem:[%s1275_s7] sm:$0xf] %v926_v45  ;;  %v1067_v46 = vpop.f32.mrb[13].mxu1 }

</bundles_post_ra>
